<compile_context>
chip_gen: v5e
topology: v5e:2x2
jax: 0.10.0
libtpu: 0.0.40
codegen_flags: <defaults>
</compile_context>

<pallas_src>
import functools

import jax
import jax.numpy as jnp
import numpy as np
from jax.experimental import pallas as pl
from jax.experimental.pallas import tpu as pltpu

BIN_SIZES = (4, 2, 1)  # mirrors nn.AdaptiveMaxPool2d((b, b)) for b in bin_size


def _pool_exact(src, b):
    """Uniform-tiling max pool of src=(TN, Hs, Ws, C) -> (TN, b, b, C).

    Requires Hs % b == 0 and Ws % b == 0 (== PyTorch adaptive pool in that case).
    H-group reduce is over an outer axis (pure VPU); W-group reduce is a small
    sublane reduce on the already H-reduced tensor.
    """
    tn, hs, ws, c = src.shape
    t = jnp.max(src.reshape(tn * b, hs // b, ws, c), axis=1)      # (TN*b, Ws, C)
    p = jnp.max(t.reshape(tn * b, b, ws // b, c), axis=2)         # (TN*b, b, C)
    return p.reshape(tn, b, b, c)


def _pool_adaptive_write(x, o_ref, offset, b, H, W):
    """General PyTorch adaptive-max-pool windows (fallback, non-divisible dims)."""
    for i in range(b):
        hs = (i * H) // b
        he = -(-((i + 1) * H) // b)          # ceil
        for j in range(b):
            ws = (j * W) // b
            we = -(-((j + 1) * W) // b)      # ceil
            win = x[:, hs:he, ws:we, :]                       # (TN, hsz, wsz, C)
            o_ref[:, offset + i * b + j, :] = jnp.max(win, axis=(1, 2))


def _spp_kernel(x_ref, o_ref, *, H, W, bin_sizes):
    # x_ref: (TN, H, W, C)  channels-last.   o_ref: (TN, sum(b*b), C)
    x = x_ref[...]
    src = x                   # current nesting source
    src_h, src_w = H, W
    offset = 0
    for b in bin_sizes:
        if src_h % b == 0 and src_w % b == 0:
            p = _pool_exact(src, b)                            # (TN, b, b, C)
            o_ref[:, offset:offset + b * b, :] = p.reshape(
                p.shape[0], b * b, p.shape[3])
            # Exact tiling composes: reuse the pooled map for coarser scales.
            src, src_h, src_w = p, b, b
        else:
            # Non-divisible: PyTorch adaptive windows on the original block.
            _pool_adaptive_write(x, o_ref, offset, b, H, W)
        offset += b * b


def spatial_pyramid_pool_adaptive(x, bin_sizes=BIN_SIZES, *, tn=None):
    N, C, H, W = x.shape
    bin_sizes = tuple(int(b) for b in bin_sizes)
    total_bins = sum(b * b for b in bin_sizes)

    # Channels-last so C occupies the 128-lane axis inside the kernel.
    x_nhwc = jnp.transpose(x, (0, 2, 3, 1))                    # (N, H, W, C)

    itemsize = jnp.dtype(x.dtype).itemsize
    bytes_per_sample = H * W * C * itemsize
    if tn is None:
        target = 4 << 20                                       # ~4 MiB input block
        tn = max(1, min(N, target // max(bytes_per_sample, 1)))
        if N > 1:
            # Keep >= 2 grid points so both v7x TensorCores get work.
            tn = max(1, min(tn, (N + 1) // 2))
    grid = (pl.cdiv(N, tn),)

    in_block = tn * bytes_per_sample
    out_block = tn * total_bins * C * itemsize
    # Double-buffered in/out + headroom; clamp to stay safe on v7x's 64 MiB VMEM.
    vmem_bytes = int(min(max(2 * (in_block + out_block) + (8 << 20), 32 << 20),
                         64 << 20))

    kernel = functools.partial(_spp_kernel, H=H, W=W, bin_sizes=bin_sizes)

    out = pl.pallas_call(
        kernel,
        out_shape=jax.ShapeDtypeStruct((N, total_bins, C), x.dtype),
        grid=grid,
        in_specs=[pl.BlockSpec((tn, H, W, C), lambda n: (n, 0, 0, 0))],
        out_specs=pl.BlockSpec((tn, total_bins, C), lambda n: (n, 0, 0)),
        compiler_params=pltpu.CompilerParams(
            dimension_semantics=("parallel",),
            vmem_limit_bytes=vmem_bytes,
        ),
    )(x_nhwc)

    # Glue: restore PyTorch per-scale channel-major order
    # ([all bins of c0][all bins of c1]...) then concat scales along dim 1.
    segs = []
    off = 0
    for b in bin_sizes:
        seg = out[:, off:off + b * b, :]                       # (N, b*b, C)
        segs.append(jnp.transpose(seg, (0, 2, 1)).reshape(N, C * b * b))
        off += b * b
    return jnp.concatenate(segs, axis=1)


def _reference_spp(x_np, bin_sizes=BIN_SIZES):
    """Pure-numpy reference reproducing PyTorch AdaptiveMaxPool2d + flatten + cat."""
    N, C, H, W = x_np.shape
    segs = []
    for b in bin_sizes:
        pooled = np.empty((N, C, b, b), dtype=x_np.dtype)
        for i in range(b):
            hs, he = (i * H) // b, ((i + 1) * H + b - 1) // b
            for j in range(b):
                ws, we = (j * W) // b, ((j + 1) * W + b - 1) // b
                pooled[:, :, i, j] = x_np[:, :, hs:he, ws:we].max(axis=(2, 3))
        segs.append(pooled.reshape(N, -1))
    return np.concatenate(segs, axis=1)


if __name__ == "__main__":
    key = jax.random.PRNGKey(0)
    # Small NCHW input consistent with the module's forward.
    x = jax.random.normal(key, (2, 4, 16, 16), dtype=jnp.float32)

    spp = spatial_pyramid_pool_adaptive(x, BIN_SIZES)
    spp = jax.block_until_ready(spp)

    expected = _reference_spp(np.asarray(x), BIN_SIZES)
    assert spp.shape == expected.shape, (spp.shape, expected.shape)
    np.testing.assert_allclose(np.asarray(spp), expected, rtol=1e-6, atol=1e-6)

    print("KERNEL_OK")
</pallas_src>

<mosaic_0001>
module attributes {stable_mosaic.version = 11 : i64} {
  func.func @_spp_kernel(%arg0: i32, %arg1: memref<1x16x16x4xf32, #tpu.memory_space<vmem>>, %arg2: memref<1x21x4xf32, #tpu.memory_space<vmem>>) attributes {dimension_semantics = [#tpu.dimension_semantics<parallel>], iteration_bounds = array<i64: 2>, scalar_prefetch = 0 : i64, scratch_operands = 0 : i64, tpu.core_type = #tpu.core_type<tc>, window_params = [{transform_indices = @transform_0, window_bounds = array<i64: 1, 16, 16, 4>}, {transform_indices = @transform_1, window_bounds = array<i64: 1, 21, 4>}]} {
    %c0 = arith.constant 0 : index
    %c0_0 = arith.constant 0 : index
    %c0_1 = arith.constant 0 : index
    %c0_2 = arith.constant 0 : index
    %0 = vector.load %arg1[%c0, %c0_0, %c0_1, %c0_2] : memref<1x16x16x4xf32, #tpu.memory_space<vmem>>, vector<1x16x16x4xf32>
    %1 = vector.shape_cast %0 : vector<1x16x16x4xf32> to vector<4x4x16x4xf32>
    %cst = arith.constant dense<0xFF800000> : vector<4x16x4xf32>
    %2 = vector.multi_reduction <maximumf>, %1, %cst [1] : vector<4x4x16x4xf32> to vector<4x16x4xf32>
    %3 = vector.shape_cast %2 : vector<4x16x4xf32> to vector<4x4x4x4xf32>
    %cst_3 = arith.constant dense<0xFF800000> : vector<4x4x4xf32>
    %4 = vector.multi_reduction <maximumf>, %3, %cst_3 [2] : vector<4x4x4x4xf32> to vector<4x4x4xf32>
    %5 = vector.shape_cast %4 : vector<4x4x4xf32> to vector<1x4x4x4xf32>
    %6 = vector.shape_cast %5 : vector<1x4x4x4xf32> to vector<1x16x4xf32>
    %c0_4 = arith.constant 0 : index
    %c0_5 = arith.constant 0 : index
    %c0_6 = arith.constant 0 : index
    %7 = vector.load %arg2[%c0_4, %c0_5, %c0_6] : memref<1x21x4xf32, #tpu.memory_space<vmem>>, vector<1x16x4xf32>
    tpu.vector_store %arg2[%c0_4, %c0_5, %c0_6], %6 {strides = array<i32>} : memref<1x21x4xf32, #tpu.memory_space<vmem>>, vector<1x16x4xf32>,
    %8 = vector.shape_cast %5 : vector<1x4x4x4xf32> to vector<2x2x4x4xf32>
    %cst_7 = arith.constant dense<0xFF800000> : vector<2x4x4xf32>
    %9 = vector.multi_reduction <maximumf>, %8, %cst_7 [1] : vector<2x2x4x4xf32> to vector<2x4x4xf32>
    %10 = vector.shape_cast %9 : vector<2x4x4xf32> to vector<2x2x2x4xf32>
    %cst_8 = arith.constant dense<0xFF800000> : vector<2x2x4xf32>
    %11 = vector.multi_reduction <maximumf>, %10, %cst_8 [2] : vector<2x2x2x4xf32> to vector<2x2x4xf32>
    %12 = vector.shape_cast %11 : vector<2x2x4xf32> to vector<1x2x2x4xf32>
    %13 = vector.shape_cast %12 : vector<1x2x2x4xf32> to vector<1x4x4xf32>
    %c0_9 = arith.constant 0 : index
    %c16 = arith.constant 16 : index
    %c0_10 = arith.constant 0 : index
    %14 = vector.load %arg2[%c0_9, %c16, %c0_10] : memref<1x21x4xf32, #tpu.memory_space<vmem>>, vector<1x4x4xf32>
    tpu.vector_store %arg2[%c0_9, %c16, %c0_10], %13 {strides = array<i32>} : memref<1x21x4xf32, #tpu.memory_space<vmem>>, vector<1x4x4xf32>,
    %cst_11 = arith.constant dense<0xFF800000> : vector<1x2x4xf32>
    %15 = vector.multi_reduction <maximumf>, %12, %cst_11 [1] : vector<1x2x2x4xf32> to vector<1x2x4xf32>
    %16 = vector.shape_cast %15 : vector<1x2x4xf32> to vector<1x1x2x4xf32>
    %cst_12 = arith.constant dense<0xFF800000> : vector<1x1x4xf32>
    %17 = vector.multi_reduction <maximumf>, %16, %cst_12 [2] : vector<1x1x2x4xf32> to vector<1x1x4xf32>
    %18 = vector.shape_cast %17 : vector<1x1x4xf32> to vector<1x1x1x4xf32>
    %19 = vector.shape_cast %18 : vector<1x1x1x4xf32> to vector<1x1x4xf32>
    %c0_13 = arith.constant 0 : index
    %c20 = arith.constant 20 : index
    %c0_14 = arith.constant 0 : index
    %20 = vector.load %arg2[%c0_13, %c20, %c0_14] : memref<1x21x4xf32, #tpu.memory_space<vmem>>, vector<1x1x4xf32>
    tpu.vector_store %arg2[%c0_13, %c20, %c0_14], %19 {strides = array<i32>} : memref<1x21x4xf32, #tpu.memory_space<vmem>>, vector<1x1x4xf32>,
    return
  }
  func.func @transform_0(%arg0: i32) -> (i32, i32, i32, i32) {
    %c0_i32 = arith.constant 0 : i32
    %c0_i32_0 = arith.constant 0 : i32
    %c0_i32_1 = arith.constant 0 : i32
    %c0_i32_2 = arith.constant 0 : i32
    return %arg0, %c0_i32, %c0_i32_0, %c0_i32_1 : i32, i32, i32, i32
  }
  func.func @transform_1(%arg0: i32) -> (i32, i32, i32) {
    %c0_i32 = arith.constant 0 : i32
    %c0_i32_0 = arith.constant 0 : i32
    %c0_i32_1 = arith.constant 0 : i32
    return %arg0, %c0_i32, %c0_i32_0 : i32, i32, i32
  }
}

</mosaic_0001>

<bundles_post_ra>
// kernel: tpu_custom_call.1
= control target key start
LH: loop header
LB: loop body
LE: loop exit
PB: predicated region body
PF: predicated region fallthrough
CT: control target
= control target key end

     0   :  { %s533_s6 = smov 0   ;;  %s742_s0 = inlined_call_operand.vmem [shape: f32[2,16,16,4], index: 0, kind: input, shape index: {}]   ;;  %s743_s1 = inlined_call_operand.vmem [shape: f32[2,21,4], index: 1, kind: output, shape index: {}]  }
   0x1 LB: > { %s495_s7 = sadd.s32 4294967295, %s521_s6   ;;  %p499_p0 = scmp.ge.s32.totalorder %s521_s6, 1  ;;  %s521_s6 = sphi %s533_s6, %s11_s6  }
   0x2   : > { %p87_p1 = scmp.lt.s32.totalorder %s521_s6, 3 }
   0x4   : > { %p88_p2 = pnand %p499_p0, %p87_p1 }
   0x5   : > { %p107_p3 = scmp.lt.s32.totalorder (!%p88_p2), %s495_s7, 1 }
   0x6   : > { %91 = sbr.rel (%p88_p2) target bundleno = 81 (0x51), region = 24 }
   0xb   : > { %s745_s7 = smov (!%p107_p3, %s495_s7), 1  ;;  %vm149_vm0 = vcmask 31744   ;;  %vm230_vm1 = vcmask 27648   ;;  %vm359_vm2 = vcmask 1041409   ;;  %vm361_vm3 = vcmask 1042434  }
   0xc   : > { %s505_s8 = sshll.u32 %s745_s7, 8  ;;  %s506_s12 = smul.u32 24, %s745_s7  ;;  %vm363_vm4 = vcmask 1043459   ;;  %vm365_vm5 = vcmask 1044484   ;;  %vm367_vm6 = vcmask 1045509   ;;  %vm369_vm7 = vcmask 1046534  }
   0xd   : > { %s547_s11 = scalar_lea.vmem %s742_s0, %s505_s8  ;;  %vm371_vm8 = vcmask 1047559   ;;  %vm438_vm9 = vcmask 24576  }
   0xe   : > { %v117_v0 = vld [vmem:[%s547_s11] sm:$0xff]  ;;  %v118_v1 = vld [vmem:[%s547_s11 + $0x8] sm:$0xff]  ;;  %v119_v2 = vld [vmem:[%s547_s11 + $0x10] sm:$0xff]  ;;  %s677_s15 = scalar_lea.vmem %s743_s1, %s506_s12 }
   0xf   : > { %v120_v3 = vld [vmem:[%s547_s11 + $0x18] sm:$0xff]  ;;  %v121_v4 = vld [vmem:[%s547_s11 + $0x20] sm:$0xff]  ;;  %v122_v5 = vld [vmem:[%s547_s11 + $0x28] sm:$0xff]  ;;  %v150_v6 = vsel %vm149_vm0, %v117_v0, -inf  ;;  %v151_v7 = vsel %vm149_vm0, %v119_v2, -inf  ;;  %v157_v8 = vsel %vm149_vm0, %v118_v1, -inf }
  0x10   : > { %v123_v9 = vld [vmem:[%s547_s11 + $0x30] sm:$0xff]  ;;  %v124_v10 = vld [vmem:[%s547_s11 + $0x38] sm:$0xff]  ;;  %v125_v11 = vld [vmem:[%s547_s11 + $0x40] sm:$0xff]  ;;  %v152_v12 = vmax.f32 %v150_v6, %v151_v7  ;;  %v153_v13 = vsel %vm149_vm0, %v121_v4, -inf  ;;  %v158_v14 = vsel %vm149_vm0, %v120_v3, -inf  ;;  %v160_v15 = vsel %vm149_vm0, %v122_v5, -inf }
  0x11   : > { %v126_v16 = vld [vmem:[%s547_s11 + $0x48] sm:$0xff]  ;;  %v127_v17 = vld [vmem:[%s547_s11 + $0x50] sm:$0xff]  ;;  %v128_v18 = vld [vmem:[%s547_s11 + $0x58] sm:$0xff]  ;;  %v155_v19 = vsel %vm149_vm0, %v123_v9, -inf  ;;  %v159_v20 = vmax.f32 %v157_v8, %v158_v14  ;;  %v162_v21 = vsel %vm149_vm0, %v124_v10, -inf  ;;  %v164_v22 = vsel %vm149_vm0, %v125_v11, -inf }
  0x12   : > { %v129_v23 = vld [vmem:[%s547_s11 + $0x60] sm:$0xff]  ;;  %v130_v24 = vld [vmem:[%s547_s11 + $0x68] sm:$0xff]  ;;  %v131_v25 = vld [vmem:[%s547_s11 + $0x70] sm:$0xff]  ;;  %v154_v26 = vmax.f32 %v152_v12, %v153_v13  ;;  %v165_v27 = vsel %vm149_vm0, %v127_v17, -inf  ;;  %v171_v28 = vsel %vm149_vm0, %v126_v16, -inf  ;;  %v172_v29 = vsel %vm149_vm0, %v128_v18, -inf }
  0x13   : > { %v132_v30 = vld [vmem:[%s547_s11 + $0x78] sm:$0xff]  ;;  %v133_v31 = vld [vmem:[%s547_s11 + $0x80] sm:$0xff]  ;;  %v134_v32 = vld [vmem:[%s547_s11 + $0x88] sm:$0xff]  ;;  %v161_v33 = vmax.f32 %v159_v20, %v160_v15  ;;  %v166_v34 = vmax.f32 %v164_v22, %v165_v27  ;;  %v167_v35 = vsel %vm149_vm0, %v129_v23, -inf  ;;  %v169_v36 = vsel %vm149_vm0, %v131_v25, -inf }
  0x14   : > { %v135_v37 = vld [vmem:[%s547_s11 + $0x90] sm:$0xff]  ;;  %v136_v38 = vld [vmem:[%s547_s11 + $0x98] sm:$0xff]  ;;  %v137_v39 = vld [vmem:[%s547_s11 + $0xa0] sm:$0xff]  ;;  %v156_v40 = vmax.f32 %v154_v26, %v155_v19  ;;  %v173_v41 = vmax.f32 %v171_v28, %v172_v29  ;;  %v174_v42 = vsel %vm149_vm0, %v130_v24, -inf  ;;  %v176_v43 = vsel %vm149_vm0, %v132_v30, -inf }
  0x15   : > { %v138_v44 = vld [vmem:[%s547_s11 + $0xa8] sm:$0xff]  ;;  %v139_v45 = vld [vmem:[%s547_s11 + $0xb0] sm:$0xff]  ;;  %v140_v46 = vld [vmem:[%s547_s11 + $0xb8] sm:$0xff]  ;;  %v163_v47 = vmax.f32 %v161_v33, %v162_v21  ;;  %v168_v48 = vmax.f32 %v166_v34, %v167_v35  ;;  %v178_v49 = vsel %vm149_vm0, %v133_v31, -inf  ;;  %v179_v50 = vsel %vm149_vm0, %v135_v37, -inf }
  0x16   : > { %v141_v51 = vld [vmem:[%s547_s11 + $0xc0] sm:$0xff]  ;;  %v143_v52 = vld [vmem:[%s547_s11 + $0xd0] sm:$0xff]  ;;  %v175_v53 = vmax.f32 %v173_v41, %v174_v42  ;;  %v180_v54 = vmax.f32 %v178_v49, %v179_v50  ;;  %v181_v55 = vsel %vm149_vm0, %v137_v39, -inf  ;;  %v183_v56 = vsel %vm149_vm0, %v139_v45, -inf  ;;  %v142_v57 = vld [vmem:[%s547_s11 + $0xc8] sm:$0xff] }
  0x17   : > { %v144_v58 = vld [vmem:[%s547_s11 + $0xd8] sm:$0xff]  ;;  %v145_v59 = vld [vmem:[%s547_s11 + $0xe0] sm:$0xff]  ;;  %v170_v60 = vmax.f32 %v168_v48, %v169_v36  ;;  %v185_v61 = vsel %vm149_vm0, %v134_v32, -inf  ;;  %v186_v62 = vsel %vm149_vm0, %v136_v38, -inf  ;;  %v188_v63 = vsel %vm149_vm0, %v138_v44, -inf  ;;  %v146_v0 = vld [vmem:[%s547_s11 + $0xe8] sm:$0xff] }
  0x18   : > { %v147_v1 = vld [vmem:[%s547_s11 + $0xf0] sm:$0xff]  ;;  %v148_v2 = vld [vmem:[%s547_s11 + $0xf8] sm:$0xff]  ;;  %v177_v3 = vmax.f32 %v175_v53, %v176_v43  ;;  %v182_v4 = vmax.f32 %v180_v54, %v181_v55  ;;  %v187_v5 = vmax.f32 %v185_v61, %v186_v62  ;;  %v190_v6 = vsel %vm149_vm0, %v140_v46, -inf }
  0x19   : > { %v192_v7 = vsel %vm149_vm0, %v141_v51, -inf  ;;  %v193_v8 = vsel %vm149_vm0, %v143_v52, -inf  ;;  %v195_v9 = vsel %vm149_vm0, %v145_v59, -inf  ;;  %v197_v10 = vsel %vm149_vm0, %v147_v1, -inf }
  0x1a   : > { %v609_v11 = vmax.f32 %v182_v4, %v183_v56  ;;  %v189_v12 = vmax.f32 %v187_v5, %v188_v63  ;;  %v194_v13 = vmax.f32 %v192_v7, %v193_v8  ;;  %v199_v14 = vsel %vm149_vm0, %v142_v57, -inf }
  0x1b   : > { %v200_v15 = vsel %vm149_vm0, %v144_v58, -inf  ;;  %v202_v16 = vsel %vm149_vm0, %v146_v0, -inf  ;;  %v204_v17 = vsel %vm149_vm0, %v148_v2, -inf  ;;  %v214_v18 = vrot.slane %v156_v40, 4 }
  0x1c   : > { %v615_v19 = vmax.f32 %v189_v12, %v190_v6  ;;  %v196_v20 = vmax.f32 %v194_v13, %v195_v9  ;;  %v201_v21 = vmax.f32 %v199_v14, %v200_v15  ;;  %v215_v22 = vrot.slane %v163_v47, 4 }
  0x1d   : > { %v216_v23 = vrot.slane %v170_v60, 4  ;;  %v217_v24 = vrot.slane %v177_v3, 4  ;;  %v218_v25 = vrot.slane %v609_v11, 4  ;;  %v231_v26 = vsel %vm230_vm1, %v156_v40, -inf }
  0x1e   : > { %v619_v27 = vmax.f32 %v196_v20, %v197_v10  ;;  %v203_v28 = vmax.f32 %v201_v21, %v202_v16  ;;  %v219_v29 = vrot.slane %v615_v19, 4  ;;  %v232_v30 = vrot.slane %v231_v26, 4 }
  0x1f   : > { %v238_v31 = vsel %vm230_vm1, %v214_v18, -inf  ;;  %v245_v32 = vsel %vm230_vm1, %v163_v47, -inf  ;;  %v252_v33 = vsel %vm230_vm1, %v215_v22, -inf  ;;  %v259_v34 = vsel %vm230_vm1, %v170_v60, -inf }
  0x20   : > { %v626_v35 = vmax.f32 %v203_v28, %v204_v17  ;;  %v220_v36 = vrot.slane %v619_v27, 4  ;;  %v233_v37 = vmax.f32 %v231_v26, %v232_v30  ;;  %v239_v38 = vrot.slane %v238_v31, 4 }
  0x21   : > { %v246_v39 = vrot.slane %v245_v32, 4  ;;  %v253_v40 = vrot.slane %v252_v33, 4  ;;  %v260_v41 = vrot.slane %v259_v34, 4  ;;  %v266_v42 = vsel %vm230_vm1, %v216_v23, -inf }
  0x22   : > { %v221_v43 = vrot.slane %v626_v35, 4  ;;  %v234_v44 = vrot.slane %v233_v37, 2  ;;  %v240_v45 = vmax.f32 %v238_v31, %v239_v38  ;;  %v267_v46 = vrot.slane %v266_v42, 4 }
  0x23   : > { %v247_v47 = vmax.f32 %v245_v32, %v246_v39  ;;  %v254_v48 = vmax.f32 %v252_v33, %v253_v40  ;;  %v261_v49 = vmax.f32 %v259_v34, %v260_v41  ;;  %v273_v50 = vsel %vm230_vm1, %v177_v3, -inf }
  0x24   : > { %v235_v51 = vmax.f32 %v233_v37, %v234_v44  ;;  %v241_v52 = vrot.slane %v240_v45, 2  ;;  %v268_v53 = vmax.f32 %v266_v42, %v267_v46  ;;  %v274_v54 = vrot.slane %v273_v50, 4 }
  0x25   : > { %v248_v55 = vrot.slane %v247_v47, 2  ;;  %v255_v56 = vrot.slane %v254_v48, 2  ;;  %v262_v57 = vrot.slane %v261_v49, 2  ;;  %v280_v58 = vsel %vm230_vm1, %v217_v24, -inf }
  0x26   : > { %v236_v59 = vrot.slane %v235_v51, 1  ;;  %v242_v60 = vmax.f32 %v240_v45, %v241_v52  ;;  %v269_v61 = vrot.slane %v268_v53, 2  ;;  %v275_v62 = vmax.f32 %v273_v50, %v274_v54 }
  0x27   : > { %v249_v63 = vmax.f32 %v247_v47, %v248_v55  ;;  %v256_v0 = vmax.f32 %v254_v48, %v255_v56  ;;  %v263_v1 = vmax.f32 %v261_v49, %v262_v57  ;;  %v281_v2 = vrot.slane %v280_v58, 4 }
  0x28   : > { %v633_v4 = vmax.f32 %v235_v51, %v236_v59  ;;  %v243_v3 = vrot.slane %v242_v60, 1  ;;  %v270_v5 = vmax.f32 %v268_v53, %v269_v61  ;;  %v276_v6 = vrot.slane %v275_v62, 2 }
  0x29   : > { %v250_v7 = vrot.slane %v249_v63, 1  ;;  %v257_v8 = vrot.slane %v256_v0, 1  ;;  %v264_v9 = vrot.slane %v263_v1, 1  ;;  %v282_v10 = vmax.f32 %v280_v58, %v281_v2 }
  0x2a   : > { %v635_v12 = vmax.f32 %v242_v60, %v243_v3  ;;  %v271_v13 = vrot.slane %v270_v5, 1  ;;  %v277_v14 = vmax.f32 %v275_v62, %v276_v6  ;;  %v287_v15 = vsel %vm230_vm1, %v609_v11, -inf }
  0x2b   : > { %v639_v16 = vmax.f32 %v249_v63, %v250_v7  ;;  %v641_v17 = vmax.f32 %v256_v0, %v257_v8  ;;  %v643_v18 = vmax.f32 %v263_v1, %v264_v9  ;;  %v283_v20 = vrot.slane %v282_v10, 2 }
  0x2c   : > { %v645_v21 = vmax.f32 %v270_v5, %v271_v13  ;;  %v278_v22 = vrot.slane %v277_v14, 1  ;;  %v288_v23 = vrot.slane %v287_v15, 4  ;;  %v294_v24 = vsel %vm230_vm1, %v218_v25, -inf }
  0x2d   : > { %v284_v26 = vmax.f32 %v282_v10, %v283_v20  ;;  %v295_v28 = vrot.slane %v294_v24, 4  ;;  %v301_v30 = vsel %vm230_vm1, %v615_v19, -inf  ;;  %v308_v11 = vsel %vm230_vm1, %v219_v29, -inf }
  0x2e   : > { %v651_v31 = vmax.f32 %v277_v14, %v278_v22  ;;  %v289_v32 = vmax.f32 %v287_v15, %v288_v23  ;;  %v302_v33 = vrot.slane %v301_v30, 4  ;;  %v309_v34 = vrot.slane %v308_v11, 4 }
  0x2f   : > { %v285_v37 = vrot.slane %v284_v26, 1  ;;  %v296_v38 = vmax.f32 %v294_v24, %v295_v28  ;;  %v315_v39 = vsel %vm230_vm1, %v619_v27, -inf  ;;  %v322_v40 = vsel %vm230_vm1, %v220_v36, -inf }
  0x30   : > { %v290_v25 = vrot.slane %v289_v32, 2  ;;  %v303_v41 = vmax.f32 %v301_v30, %v302_v33  ;;  %v310_v42 = vmax.f32 %v308_v11, %v309_v34  ;;  %v316_v44 = vrot.slane %v315_v39, 4 }
  0x31   : > { %v656_v45 = vmax.f32 %v284_v26, %v285_v37  ;;  %v297_v19 = vrot.slane %v296_v38, 2  ;;  %v323_v29 = vrot.slane %v322_v40, 4  ;;  %v329_v46 = vsel %vm230_vm1, %v626_v35, -inf }
  0x32   : > { %v291_v47 = vmax.f32 %v289_v32, %v290_v25  ;;  %v304_v48 = vrot.slane %v303_v41, 2  ;;  %v311_v49 = vrot.slane %v310_v42, 2  ;;  %v317_v50 = vmax.f32 %v315_v39, %v316_v44 }
  0x33   : > { %v298_v51 = vmax.f32 %v296_v38, %v297_v19  ;;  %v324_v52 = vmax.f32 %v322_v40, %v323_v29  ;;  %v330_v27 = vrot.slane %v329_v46, 4  ;;  %v336_v36 = vsel %vm230_vm1, %v221_v43, -inf }
  0x34   : > { %v292_v53 = vrot.slane %v291_v47, 1  ;;  %v305_v54 = vmax.f32 %v303_v41, %v304_v48  ;;  %v312_v55 = vmax.f32 %v310_v42, %v311_v49  ;;  %v318_v56 = vrot.slane %v317_v50, 2 }
  0x35   : > { %v299_v57 = vrot.slane %v298_v51, 1  ;;  %v325_v58 = vrot.slane %v324_v52, 2  ;;  %v331_v59 = vmax.f32 %v329_v46, %v330_v27  ;;  %v337_v60 = vrot.slane %v336_v36, 4 }
  0x36   : > { %v293_v61 = vmax.f32 %v291_v47, %v292_v53  ;;  %v306_v62 = vrot.slane %v305_v54, 1  ;;  %v313_v63 = vrot.slane %v312_v55, 1  ;;  %v319_v0 = vmax.f32 %v317_v50, %v318_v56 }
  0x37   : > { %v300_v1 = vmax.f32 %v298_v51, %v299_v57  ;;  %v326_v2 = vmax.f32 %v324_v52, %v325_v58  ;;  %v332_v3 = vrot.slane %v331_v59, 2  ;;  %v338_v5 = vmax.f32 %v336_v36, %v337_v60 }
  0x38   : > { %v307_v35 = vmax.f32 %v305_v54, %v306_v62  ;;  %v314_v6 = vmax.f32 %v312_v55, %v313_v63  ;;  %v320_v43 = vrot.slane %v319_v0, 1  ;;  %v360_v10 = vsel %vm359_vm2, %v635_v12, %v633_v4 }
  0x39   : > { %v327_v7 = vrot.slane %v326_v2, 1  ;;  %v333_v8 = vmax.f32 %v331_v59, %v332_v3  ;;  %v339_v9 = vrot.slane %v338_v5, 2  ;;  %v362_v22 = vsel %vm361_vm3, %v639_v16, %v360_v10 }
  0x3a   : > { %v321_v13 = vmax.f32 %v319_v0, %v320_v43  ;;  %v364_v23 = vsel %vm363_vm4, %v641_v17, %v362_v22  ;;  %v373_v30 = vsel %vm359_vm2, %v300_v1, %v293_v61  ;;  %v384_v33 = vsel %vm149_vm0, %v633_v4, -inf }
  0x3b   : > { %v328_v14 = vmax.f32 %v326_v2, %v327_v7  ;;  %v334_v15 = vrot.slane %v333_v8, 1  ;;  %v340_v20 = vmax.f32 %v338_v5, %v339_v9  ;;  %v366_v28 = vsel %vm365_vm5, %v643_v18, %v364_v23 }
  0x3c   : > { %v368_v11 = vsel %vm367_vm6, %v645_v21, %v366_v28  ;;  %v374_v32 = vsel %vm361_vm3, %v307_v35, %v373_v30  ;;  %v385_v34 = vsel %vm149_vm0, %v643_v18, -inf  ;;  %v387_v42 = vsel %vm149_vm0, %v635_v12, -inf }
  0x3d   : > { %v335_v24 = vmax.f32 %v333_v8, %v334_v15  ;;  %v341_v26 = vrot.slane %v340_v20, 1  ;;  %v370_v38 = vsel %vm369_vm7, %v651_v31, %v368_v11  ;;  %v375_v39 = vsel %vm363_vm4, %v314_v6, %v374_v32 }
  0x3e   : > { %v386_v40 = vmax.f32 %v384_v33, %v385_v34  ;;  %v372_v25 = vsel %vm371_vm8, %v656_v45, %v370_v38  ;;  %v376_v41 = vsel %vm365_vm5, %v321_v13, %v375_v39  ;;  %v388_v4 = vsel %vm149_vm0, %v645_v21, -inf }
  0x3f   : > { %v342_v37 = vmax.f32 %v340_v20, %v341_v26  ;;  %v377_v18 = vsel %vm367_vm6, %v328_v14, %v376_v41  ;;  %382 = vst.msk [vmem:[%s677_s15] sm:$0xff] %vm149_vm0, %v372_v25  ;;  %v389_v44 = vmax.f32 %v387_v42, %v388_v4  ;;  %v390_v19 = vsel %vm149_vm0, %v639_v16, -inf }
  0x40   : > { %v391_v29 = vsel %vm149_vm0, %v651_v31, -inf  ;;  %v378_v46 = vsel %vm369_vm7, %v335_v24, %v377_v18  ;;  %v393_v12 = vsel %vm149_vm0, %v641_v17, -inf  ;;  %v394_v21 = vsel %vm149_vm0, %v656_v45, -inf }
  0x41   : > { %v392_v47 = vmax.f32 %v390_v19, %v391_v29  ;;  %v379_v48 = vsel %vm371_vm8, %v342_v37, %v378_v46  ;;  %v395_v49 = vmax.f32 %v393_v12, %v394_v21  ;;  %v396_v50 = vsel %vm149_vm0, %v293_v61, -inf }
  0x42   : > { %v397_v51 = vsel %vm149_vm0, %v321_v13, -inf  ;;  %383 = vst.msk [vmem:[%s677_s15 + $0x8] sm:$0xff] %vm149_vm0, %v379_v48  ;;  %v399_v31 = vsel %vm149_vm0, %v300_v1, -inf  ;;  %v400_v52 = vsel %vm149_vm0, %v328_v14, -inf  ;;  %v402_v27 = vsel %vm149_vm0, %v307_v35, -inf }
  0x43   : > { %v398_v16 = vmax.f32 %v396_v50, %v397_v51  ;;  %v401_v17 = vmax.f32 %v399_v31, %v400_v52  ;;  %v403_v36 = vsel %vm149_vm0, %v335_v24, -inf  ;;  %v405_v45 = vsel %vm149_vm0, %v314_v6, -inf }
  0x44   : > { %v406_v53 = vsel %vm149_vm0, %v342_v37, -inf  ;;  %v404_v54 = vmax.f32 %v402_v27, %v403_v36  ;;  %v408_v56 = vsel %vm149_vm0, %v386_v40, -inf  ;;  %v409_v57 = vsel %vm149_vm0, %v389_v44, -inf }
  0x45   : > { %v407_v55 = vmax.f32 %v405_v45, %v406_v53  ;;  %v410_v58 = vmax.f32 %v408_v56, %v409_v57  ;;  %v411_v59 = vsel %vm149_vm0, %v392_v47, -inf  ;;  %v412_v60 = vsel %vm149_vm0, %v395_v49, -inf }
  0x46   : > { %v414_v61 = vsel %vm149_vm0, %v398_v16, -inf  ;;  %v413_v62 = vmax.f32 %v411_v59, %v412_v60  ;;  %v415_v63 = vsel %vm149_vm0, %v401_v17, -inf  ;;  %v417_v0 = vsel %vm149_vm0, %v404_v54, -inf }
  0x47   : > { %v418_v1 = vsel %vm149_vm0, %v407_v55, -inf  ;;  %v416_v2 = vmax.f32 %v414_v61, %v415_v63  ;;  %v429_v5 = vsel %vm149_vm0, %v410_v58, -inf }
  0x48   : > { %v419_v3 = vmax.f32 %v417_v0, %v418_v1  ;;  %v424_v35 = vsel %vm359_vm2, %v413_v62, %v410_v58  ;;  %v432_v6 = vsel %vm149_vm0, %v413_v62, -inf }
  0x49   : > { %v425_v43 = vsel %vm361_vm3, %v416_v2, %v424_v35  ;;  %v430_v7 = vsel %vm149_vm0, %v416_v2, -inf }
  0x4a   : > { %v433_v8 = vsel %vm149_vm0, %v419_v3, -inf  ;;  %v426_v9 = vsel %vm363_vm4, %v419_v3, %v425_v43  ;;  %v431_v10 = vmax.f32 %v429_v5, %v430_v7 }
  0x4b   : > { %v434_v13 = vmax.f32 %v432_v6, %v433_v8  ;;  %428 = vst.msk [vmem:[%s677_s15 + $0x10] sm:$0xf] %vm230_vm1, %v426_v9 }
  0x4c   : > { %v435_v14 = vsel %vm149_vm0, %v431_v10, -inf }
  0x4d   : > { %v436_v15 = vsel %vm149_vm0, %v434_v13, -inf }
  0x4e   : > { %v437_v20 = vmax.f32 %v435_v14, %v436_v15 }
  0x50   : > { %439 = vst.msk [vmem:[%s677_s15 + $0x14] sm:$0x1] %vm438_vm9, %v437_v20 }
  0x51 PF: > { %s11_s6 = sadd.s32 1, %s521_s6  }
  0x52   : > { %p8_p4 = scmp.ge.s32.totalorder %s11_s6, 4  }
  0x54   :  { %10 = sbr.rel (!%p8_p4) target bundleno = 1 (0x1), region = 54 }

</bundles_post_ra>
